<compile_context>
chip_gen: v5e
topology: v5e:2x2
jax: 0.10.0
libtpu: 0.0.40
codegen_flags: <defaults>
</compile_context>

<pallas_src>
import functools
import math

import jax
import jax.numpy as jnp
from jax import lax
from jax.experimental import pallas as pl
from jax.experimental.pallas import tpu as pltpu

_TILE_BYTES = 4 << 20             # ~4 MiB input block per grid step
_VMEM_LIMIT = 48 * 1024 * 1024    # scoped VMEM: safe on v7x (64 MiB phys), ample on v5e/v6e
_BIG = 2 ** 31 - 1                # int32 "infinity" index sentinel
_L_CAP = 256                      # lane tile cap for the mid-axis kernel (bounds vregs)
_K_LANE_CAP = 1024                # lane tile cap for the last-axis kernel


def _sublane(itemsize):
    return {4: 8, 2: 16, 1: 32}.get(itemsize, 8)


def _compute_dtype(dtype):
    """Comparison dtype: keep f32/bf16 native, other floats -> f32, ints/bool -> int32."""
    if dtype == jnp.float32 or dtype == jnp.bfloat16:
        return dtype
    if jnp.issubdtype(dtype, jnp.floating):
        return jnp.float32
    # TODO(synk): int64 / uint32 magnitudes >= 2^31 need an x64 path.
    return jnp.int32


def _lowest(dtype):
    if jnp.issubdtype(dtype, jnp.floating):
        return float("-inf")
    return int(jnp.iinfo(dtype).min)


# ---------------------------------------------------------------------------
# Kernel 1: argmax over the MIDDLE axis of a (R, K, L) view.
# Grid = (r_tiles, l_tiles, k_tiles); K is last / "arbitrary".
# ---------------------------------------------------------------------------
def _argmax_mid_kernel(x_ref, *refs, k_total, chunk, need_max, cdtype, fill):
    if need_max:
        idx_ref, max_ref, max_sc, idx_sc = refs
    else:
        idx_ref, max_sc, idx_sc = refs

    kstep = pl.program_id(2)
    tr, tk, tl = x_ref.shape
    k_base = kstep * tk
    mask_tail = (k_total % tk) != 0          # static: only emit the mask when needed
    big = jnp.int32(_BIG)
    fill_c = jnp.asarray(fill, dtype=cdtype)

    @pl.when(kstep == 0)
    def _():
        max_sc[...] = jnp.full(max_sc.shape, fill, max_sc.dtype)
        idx_sc[...] = jnp.zeros(idx_sc.shape, jnp.int32)

    def fold(carry, start, csize):
        m, bi = carry
        xc = x_ref[:, pl.ds(start, csize), :].astype(cdtype)      # (tr, csize, tl)
        kk = lax.broadcasted_iota(jnp.int32, xc.shape, 1)         # local chunk index
        if mask_tail:
            xc = jnp.where(kk + (k_base + start) < k_total, xc, fill_c)
        cm = jnp.max(xc, axis=1)                                  # (tr, tl)
        ci = jnp.min(jnp.where(xc == cm[:, None, :], kk, big), axis=1)
        ci = ci + (k_base + start)                                # first global idx at max
        better = cm > m                                           # strict > keeps earliest
        return jnp.where(better, cm, m), jnp.where(better, ci, bi)

    carry = (jnp.full((tr, tl), fill, cdtype), jnp.zeros((tr, tl), jnp.int32))
    n_full, rem = tk // chunk, tk % chunk
    if n_full > 0:
        carry = lax.fori_loop(
            0, n_full,
            lambda c, acc: fold(acc, pl.multiple_of(c * chunk, chunk), chunk),
            carry)
    if rem:
        carry = fold(carry, n_full * chunk, rem)
    m, bi = carry

    # Fold this step's result into the cross-step accumulators (init is the identity).
    better = m > max_sc[...]
    max_sc[...] = jnp.where(better, m, max_sc[...])
    idx_sc[...] = jnp.where(better, bi, idx_sc[...])

    @pl.when(kstep == pl.num_programs(2) - 1)
    def _():
        idx_ref[...] = idx_sc[...]
        if need_max:
            max_ref[...] = max_sc[...]


def _choose_tiles_mid(R, K, L, itemsize):
    sub = _sublane(itemsize)
    budget = max(1, _TILE_BYTES // itemsize)     # elements per input block
    TL = L if L <= _L_CAP else _L_CAP            # lane tile (multiple of 128 when capped)
    TR = R if R < 8 else 8                       # small row tile keeps chunk work in vregs
    cap_k = max(sub, budget // max(1, TR * TL))
    TK = K if K <= cap_k else max(sub, (cap_k // sub) * sub)
    # TODO(synk): tiny-K mid-axis shapes stay step-overhead bound with TR<=8.
    return TR, TK, TL


def _argmax_mid_axis(x3, need_max):
    """x3: (R, K, L) -> idx (R, L) int32 [, max (R, L)], argmax over K."""
    R, K, L = x3.shape
    cdtype = _compute_dtype(x3.dtype)
    fill = _lowest(cdtype)
    TR, TK, TL = _choose_tiles_mid(R, K, L, x3.dtype.itemsize)
    chunk = _sublane(x3.dtype.itemsize)
    grid = (pl.cdiv(R, TR), pl.cdiv(L, TL), pl.cdiv(K, TK))

    out_shape = [jax.ShapeDtypeStruct((R, L), jnp.int32)]
    out_specs = [pl.BlockSpec((TR, TL), lambda r, l, k: (r, l))]
    if need_max:
        out_shape.append(jax.ShapeDtypeStruct((R, L), cdtype))
        out_specs.append(pl.BlockSpec((TR, TL), lambda r, l, k: (r, l)))

    kernel = functools.partial(_argmax_mid_kernel, k_total=K, chunk=chunk,
                               need_max=need_max, cdtype=cdtype, fill=fill)
    outs = pl.pallas_call(
        kernel,
        out_shape=tuple(out_shape),
        grid_spec=pltpu.PrefetchScalarGridSpec(
            num_scalar_prefetch=0,
            grid=grid,
            in_specs=[pl.BlockSpec((TR, TK, TL), lambda r, l, k: (r, k, l))],
            out_specs=tuple(out_specs),
            scratch_shapes=[pltpu.VMEM((TR, TL), cdtype),
                            pltpu.VMEM((TR, TL), jnp.int32)],
        ),
        compiler_params=pltpu.CompilerParams(
            dimension_semantics=("parallel", "parallel", "arbitrary"),
            vmem_limit_bytes=_VMEM_LIMIT,
        ),
    )(x3)
    if need_max:
        return outs[0], outs[1]
    return outs[0], None


# ---------------------------------------------------------------------------
# Kernel 2: argmax over the LAST axis of a (R, K) view (K on lanes).
# Grid = (r_tiles, k_tiles); K is last / "arbitrary".
# ---------------------------------------------------------------------------
def _argmax_last_kernel(x_ref, *refs, k_total, rchunk, need_max, cdtype, fill):
    if need_max:
        idx_ref, max_ref, max_sc, idx_sc = refs
    else:
        idx_ref, max_sc, idx_sc = refs

    kstep = pl.program_id(1)
    tr, tk = x_ref.shape
    k_base = kstep * tk
    mask_tail = (k_total % tk) != 0
    big = jnp.int32(_BIG)
    fill_c = jnp.asarray(fill, dtype=cdtype)

    @pl.when(kstep == 0)
    def _():
        max_sc[...] = jnp.full(max_sc.shape, fill, max_sc.dtype)
        idx_sc[...] = jnp.zeros(idx_sc.shape, jnp.int32)

    # Hoisted (constant across row chunks): local lane index and validity mask.
    lane = lax.broadcasted_iota(jnp.int32, (1, tk), 1)
    if mask_tail:
        valid = (lane + k_base) < k_total

    def fold(start, nrows):
        rows = pl.ds(start, nrows)
        xc = x_ref[rows, :].astype(cdtype)                        # (nrows, tk)
        if mask_tail:
            xc = jnp.where(valid, xc, fill_c)
        cm = jnp.max(xc, axis=1, keepdims=True)                   # (nrows, 1)
        ci = jnp.min(jnp.where(xc == cm, lane, big),
                     axis=1, keepdims=True) + k_base              # first idx at max
        better = cm > max_sc[rows, :]                             # strict > keeps earliest
        max_sc[rows, :] = jnp.where(better, cm, max_sc[rows, :])
        idx_sc[rows, :] = jnp.where(better, ci, idx_sc[rows, :])

    n_full, rem = tr // rchunk, tr % rchunk
    if n_full > 0:
        @pl.loop(0, n_full)
        def _(c):
            fold(pl.multiple_of(c * rchunk, rchunk), rchunk)
    if rem:
        fold(n_full * rchunk, rem)

    @pl.when(kstep == pl.num_programs(1) - 1)
    def _():
        idx_ref[...] = idx_sc[...]
        if need_max:
            max_ref[...] = max_sc[...]


def _choose_tiles_last(R, K, itemsize):
    budget = max(1, _TILE_BYTES // itemsize)
    TK = K if K <= _K_LANE_CAP else _K_LANE_CAP        # lane tile (mult of 128 when capped)
    cap_r = max(8, budget // max(1, TK))
    TR = R if R <= cap_r else (cap_r // 8) * 8
    # v7x megacore: expose >= 2 parallel row tiles whenever rows allow it.
    if TR >= R and R >= 16:
        TR = max(8, ((-(-R // 2) + 7) // 8) * 8)
    return TR, TK


def _argmax_last_axis(x2, need_max):
    """x2: (R, K) -> idx (R, 1) int32 [, max (R, 1)], argmax over K (lanes)."""
    R, K = x2.shape
    cdtype = _compute_dtype(x2.dtype)
    fill = _lowest(cdtype)
    TR, TK = _choose_tiles_last(R, K, x2.dtype.itemsize)
    rchunk = _sublane(x2.dtype.itemsize)
    grid = (pl.cdiv(R, TR), pl.cdiv(K, TK))

    out_shape = [jax.ShapeDtypeStruct((R, 1), jnp.int32)]
    out_specs = [pl.BlockSpec((TR, 1), lambda r, k: (r, 0))]
    if need_max:
        out_shape.append(jax.ShapeDtypeStruct((R, 1), cdtype))
        out_specs.append(pl.BlockSpec((TR, 1), lambda r, k: (r, 0)))

    kernel = functools.partial(_argmax_last_kernel, k_total=K, rchunk=rchunk,
                               need_max=need_max, cdtype=cdtype, fill=fill)
    outs = pl.pallas_call(
        kernel,
        out_shape=tuple(out_shape),
        grid_spec=pltpu.PrefetchScalarGridSpec(
            num_scalar_prefetch=0,
            grid=grid,
            in_specs=[pl.BlockSpec((TR, TK), lambda r, k: (r, k))],
            out_specs=tuple(out_specs),
            scratch_shapes=[pltpu.VMEM((TR, 1), cdtype),
                            pltpu.VMEM((TR, 1), jnp.int32)],
        ),
        compiler_params=pltpu.CompilerParams(
            dimension_semantics=("parallel", "arbitrary"),
            vmem_limit_bytes=_VMEM_LIMIT,
        ),
    )(x2)
    if need_max:
        return outs[0], outs[1]
    return outs[0], None


# ---------------------------------------------------------------------------
# Module forward
# ---------------------------------------------------------------------------
@functools.partial(jax.jit, static_argnames=("dim", "keep_dims"))
def argmax_module(x, dim=None, keep_dims=True):
    """Forward pass of ArgMaxModule.

    NOTE: mirrors the torch module's `if self.dim:` truthiness exactly —
    dim=None *and* dim=0 both take the GLOBAL argmax path.
    """
    if dim:
        axis = dim % x.ndim
        shape = x.shape
        R = math.prod(shape[:axis])
        K = shape[axis]
        L = math.prod(shape[axis + 1:])
        if L == 1:
            # Last (contiguous) axis -> lanes-on-K kernel (dense 128-lane DMA).
            idx, _ = _argmax_last_axis(x.reshape(R, K), need_max=False)      # (R, 1)
        else:
            # TODO(synk): for 1 < L < 128 a packed lanes-on-K layout would be denser.
            idx, _ = _argmax_mid_axis(x.reshape(R, K, L), need_max=False)    # (R, L)
        if keep_dims:
            out_shape = shape[:axis] + (1,) + shape[axis + 1:]
        else:
            out_shape = shape[:axis] + shape[axis + 1:]
        return idx.reshape(out_shape)

    # Global argmax over the flattened tensor (dim is None or 0 -> torch truthiness).
    if x.ndim == 0:
        return jnp.zeros((), jnp.int32)
    shape = x.shape
    cols, split = 1, x.ndim
    for ax in range(x.ndim - 1, -1, -1):   # fold trailing axes onto lanes (free reshape)
        cols *= shape[ax]
        split = ax
        if cols >= 512:
            break
    rows = math.prod(shape[:split])
    idx2, max2 = _argmax_last_axis(x.reshape(rows, cols), need_max=True)     # (rows, 1)
    row_max = max2[:, 0]
    flat_idx = jnp.arange(rows, dtype=jnp.int32) * jnp.int32(cols) + idx2[:, 0]
    gmax = jnp.max(row_max)
    big = jnp.int32(_BIG)
    # Ties across rows -> smallest flat index (first occurrence).
    return jnp.min(jnp.where(row_max == gmax, flat_idx, big))
    # TODO(synk): torch returns int64 indices; int32 overflows for >= 2^31 elements.


if __name__ == "__main__":
    key = jax.random.PRNGKey(0)
    x = jax.random.normal(key, (2, 4, 16, 16), dtype=jnp.float32)

    # dim specified (middle axis), keepDims=True  -> mid-axis kernel
    out_mid = jax.block_until_ready(argmax_module(x, dim=1, keep_dims=True))
    ref_mid = jnp.argmax(x, axis=1, keepdims=True).astype(jnp.int32)
    assert out_mid.shape == (2, 1, 16, 16), out_mid.shape
    assert jnp.array_equal(out_mid, ref_mid), "mid-axis argmax mismatch"

    # dim specified (last axis), keepDims=False   -> lanes-on-K kernel
    out_last = jax.block_until_ready(argmax_module(x, dim=3, keep_dims=False))
    ref_last = jnp.argmax(x, axis=3).astype(jnp.int32)
    assert out_last.shape == (2, 4, 16), out_last.shape
    assert jnp.array_equal(out_last, ref_last), "last-axis argmax mismatch"

    # bf16, negative dim, odd extents                -> bf16 path, no f32 upcast
    xb = jax.random.normal(jax.random.PRNGKey(1), (3, 5, 7)).astype(jnp.bfloat16)
    out_bf = jax.block_until_ready(argmax_module(xb, dim=-1, keep_dims=True))
    ref_bf = jnp.argmax(xb, axis=-1, keepdims=True).astype(jnp.int32)
    assert out_bf.shape == (3, 5, 1), out_bf.shape
    assert jnp.array_equal(out_bf, ref_bf), "bf16 last-axis argmax mismatch"

    # dim=None -> global argmax (scalar), no padding/concatenate copy
    out_glob = jax.block_until_ready(argmax_module(x, dim=None))
    ref_glob = jnp.argmax(x).astype(jnp.int32)
    assert out_glob.shape == (), out_glob.shape
    assert int(out_glob) == int(ref_glob), "global argmax mismatch"

    print("KERNEL_OK")
</pallas_src>

<mosaic_0001>
module attributes {stable_mosaic.version = 11 : i64} {
  func.func @_argmax_mid_kernel(%arg0: i32, %arg1: i32, %arg2: i32, %arg3: memref<2x4x256xf32, #tpu.memory_space<vmem>>, %arg4: memref<2x256xi32, #tpu.memory_space<vmem>>, %arg5: memref<2x256xf32, #tpu.memory_space<vmem>>, %arg6: memref<2x256xi32, #tpu.memory_space<vmem>>) attributes {dimension_semantics = [#tpu.dimension_semantics<parallel>, #tpu.dimension_semantics<parallel>, #tpu.dimension_semantics<arbitrary>], iteration_bounds = array<i64: 1, 1, 1>, scalar_prefetch = 0 : i64, scratch_operands = 2 : i64, tpu.core_type = #tpu.core_type<tc>, window_params = [{transform_indices = @transform_0, window_bounds = array<i64: 2, 4, 256>}, {transform_indices = @transform_1, window_bounds = array<i64: 2, 256>}]} {
    %c4_i32 = arith.constant 4 : i32
    %0 = arith.muli %arg2, %c4_i32 : i32
    %c0_i32 = arith.constant 0 : i32
    %1 = arith.cmpi eq, %arg2, %c0_i32 : i32
    %2 = arith.extui %1 : i1 to i32
    %c0_i32_0 = arith.constant 0 : i32
    %3 = arith.cmpi ne, %2, %c0_i32_0 : i32
    scf.if %3 {
      %cst_19 = arith.constant 0xFF800000 : f32
      %32 = vector.broadcast %cst_19 : f32 to vector<2x256xf32>
      %c0_20 = arith.constant 0 : index
      %c0_21 = arith.constant 0 : index
      %33 = vector.load %arg5[%c0_20, %c0_21] : memref<2x256xf32, #tpu.memory_space<vmem>>, vector<2x256xf32>
      tpu.vector_store %arg5[%c0_20, %c0_21], %32 {strides = array<i32>} : memref<2x256xf32, #tpu.memory_space<vmem>>, vector<2x256xf32>,
      %c0_i32_22 = arith.constant 0 : i32
      %34 = vector.broadcast %c0_i32_22 : i32 to vector<2x256xi32>
      %c0_23 = arith.constant 0 : index
      %c0_24 = arith.constant 0 : index
      %35 = vector.load %arg6[%c0_23, %c0_24] : memref<2x256xi32, #tpu.memory_space<vmem>>, vector<2x256xi32>
      tpu.vector_store %arg6[%c0_23, %c0_24], %34 {strides = array<i32>} : memref<2x256xi32, #tpu.memory_space<vmem>>, vector<2x256xi32>,
    } else {
    }
    %cst = arith.constant 0xFF800000 : f32
    %4 = vector.broadcast %cst : f32 to vector<2x256xf32>
    %c0_i32_1 = arith.constant 0 : i32
    %5 = vector.broadcast %c0_i32_1 : i32 to vector<2x256xi32>
    %c0 = arith.constant 0 : index
    %c0_2 = arith.constant 0 : index
    %c0_3 = arith.constant 0 : index
    %6 = vector.load %arg3[%c0, %c0_2, %c0_3] : memref<2x4x256xf32, #tpu.memory_space<vmem>>, vector<2x4x256xf32>
    %7 = tpu.iota {dimensions = array<i32: 1>} : vector<2x4x256xi32>
    %cst_4 = arith.constant dense<0xFF800000> : vector<2x256xf32>
    %8 = vector.multi_reduction <maximumf>, %6, %cst_4 [1] : vector<2x4x256xf32> to vector<2x256xf32>
    %9 = vector.shape_cast %8 : vector<2x256xf32> to vector<2x1x256xf32>
    %10 = vector.broadcast %9 : vector<2x1x256xf32> to vector<2x4x256xf32>
    %11 = arith.cmpf oeq, %6, %10 : vector<2x4x256xf32>
    %c2147483647_i32 = arith.constant 2147483647 : i32
    %12 = vector.broadcast %c2147483647_i32 : i32 to vector<2x4x256xi32>
    %13 = arith.select %11, %7, %12 : vector<2x4x256xi1>, vector<2x4x256xi32>
    %cst_5 = arith.constant dense<2147483647> : vector<2x256xi32>
    %14 = vector.multi_reduction <minsi>, %13, %cst_5 [1] : vector<2x4x256xi32> to vector<2x256xi32>
    %c0_i32_6 = arith.constant 0 : i32
    %15 = arith.addi %0, %c0_i32_6 : i32
    %16 = vector.broadcast %15 : i32 to vector<2x256xi32>
    %17 = arith.addi %14, %16 : vector<2x256xi32>
    %18 = arith.cmpf ogt, %8, %4 : vector<2x256xf32>
    %19 = arith.select %18, %8, %4 : vector<2x256xi1>, vector<2x256xf32>
    %20 = arith.select %18, %17, %5 : vector<2x256xi1>, vector<2x256xi32>
    %c0_7 = arith.constant 0 : index
    %c0_8 = arith.constant 0 : index
    %21 = vector.load %arg5[%c0_7, %c0_8] : memref<2x256xf32, #tpu.memory_space<vmem>>, vector<2x256xf32>
    %22 = arith.cmpf ogt, %19, %21 : vector<2x256xf32>
    %c0_9 = arith.constant 0 : index
    %c0_10 = arith.constant 0 : index
    %23 = vector.load %arg5[%c0_9, %c0_10] : memref<2x256xf32, #tpu.memory_space<vmem>>, vector<2x256xf32>
    %24 = arith.select %22, %19, %23 : vector<2x256xi1>, vector<2x256xf32>
    %c0_11 = arith.constant 0 : index
    %c0_12 = arith.constant 0 : index
    %25 = vector.load %arg5[%c0_11, %c0_12] : memref<2x256xf32, #tpu.memory_space<vmem>>, vector<2x256xf32>
    tpu.vector_store %arg5[%c0_11, %c0_12], %24 {strides = array<i32>} : memref<2x256xf32, #tpu.memory_space<vmem>>, vector<2x256xf32>,
    %c0_13 = arith.constant 0 : index
    %c0_14 = arith.constant 0 : index
    %26 = vector.load %arg6[%c0_13, %c0_14] : memref<2x256xi32, #tpu.memory_space<vmem>>, vector<2x256xi32>
    %27 = arith.select %22, %20, %26 : vector<2x256xi1>, vector<2x256xi32>
    %c0_15 = arith.constant 0 : index
    %c0_16 = arith.constant 0 : index
    %28 = vector.load %arg6[%c0_15, %c0_16] : memref<2x256xi32, #tpu.memory_space<vmem>>, vector<2x256xi32>
    tpu.vector_store %arg6[%c0_15, %c0_16], %27 {strides = array<i32>} : memref<2x256xi32, #tpu.memory_space<vmem>>, vector<2x256xi32>,
    %c0_i32_17 = arith.constant 0 : i32
    %29 = arith.cmpi eq, %arg2, %c0_i32_17 : i32
    %30 = arith.extui %29 : i1 to i32
    %c0_i32_18 = arith.constant 0 : i32
    %31 = arith.cmpi ne, %30, %c0_i32_18 : i32
    scf.if %31 {
      %c0_19 = arith.constant 0 : index
      %c0_20 = arith.constant 0 : index
      %32 = vector.load %arg6[%c0_19, %c0_20] : memref<2x256xi32, #tpu.memory_space<vmem>>, vector<2x256xi32>
      %c0_21 = arith.constant 0 : index
      %c0_22 = arith.constant 0 : index
      %33 = vector.load %arg4[%c0_21, %c0_22] : memref<2x256xi32, #tpu.memory_space<vmem>>, vector<2x256xi32>
      tpu.vector_store %arg4[%c0_21, %c0_22], %32 {strides = array<i32>} : memref<2x256xi32, #tpu.memory_space<vmem>>, vector<2x256xi32>,
    } else {
    }
    return
  }
  func.func @transform_0(%arg0: i32, %arg1: i32, %arg2: i32) -> (i32, i32, i32) {
    %c0_i32 = arith.constant 0 : i32
    return %arg0, %arg2, %arg1 : i32, i32, i32
  }
  func.func @transform_1(%arg0: i32, %arg1: i32, %arg2: i32) -> (i32, i32) {
    %c0_i32 = arith.constant 0 : i32
    return %arg0, %arg1 : i32, i32
  }
}

</mosaic_0001>

<bundles_post_ra>
// kernel: argmax_module.1
= control target key start
LH: loop header
LB: loop body
LE: loop exit
PB: predicated region body
PF: predicated region fallthrough
CT: control target
= control target key end

     0   :  { %v229_v2 = vmov -inf   ;;  %vm32_vm0 = vcmask 1043456   ;;  %v17_v17 = vlaneseq  ;;  %v230_v19 = vmov 0   ;;  %s341_s0 = inlined_call_operand.vmem [shape: f32[2,4,256], index: 0, kind: input, shape index: {}]   ;;  %s342_s1 = inlined_call_operand.vmem [shape: s32[2,256], index: 1, kind: output, shape index: {}]  }
   0x1   :  { %v15_v0 = vld [vmem:[%s341_s0] sm:$0xff]  ;;  %v16_v1 = vld [vmem:[%s341_s0 + $0x8] sm:$0xff]  ;;  %13 = vst [vmem:[#allocation2] sm:$0xf] %v229_v2  ;;  %v231_v22 = vmov 839922192  }
   0x2   :  { %21 = vst [vmem:[#allocation1] ss:$2 sm:$0xff] %v15_v0  ;;  %v74_v23 = vunpack.c.l.s4 %v231_v22  ;;  %v18_v29 = vshrl.u32 %v17_v17, 7 }
   0x3   :  { %25 = vst [vmem:[#allocation1 + $0x10] ss:$2 sm:$0xff] %v16_v1 }
   0x4   :  { %14 = vst [vmem:[#allocation3] sm:$0xf] %v230_v19  ;;  %v75_v33 = vunpack.c.0.s8 %v74_v23 }
   0x6   :  { %v76_v40 = vperm.slane %v18_v29, %v75_v33 }
   0x8   :  { %v143_v48 = vld [vmem:[#allocation2] sm:$0xf] }
   0x9   :  { %v22_v3 = vld.sshfl [vmem:[#allocation1] sm:$0xff pattern:$0x75316420]  ;;  %v23_v4 = vld.sshfl [vmem:[#allocation1 + $0x8] sm:$0xff pattern:$0x75316420] }
   0xa   :  { %v33_v5 = vsel %vm32_vm0, %v22_v3, -inf  ;;  %v40_v6 = vsel %vm32_vm0, %v23_v4, -inf  ;;  %v26_v7 = vld.sshfl [vmem:[#allocation1 + $0x10] sm:$0xff pattern:$0x75316420] }
   0xb   :  { %v34_v8 = vrot.slane %v33_v5, 4  ;;  %v41_v9 = vrot.slane %v40_v6, 4  ;;  %v27_v10 = vld.sshfl [vmem:[#allocation1 + $0x18] sm:$0xff pattern:$0x75316420]  ;;  %v47_v11 = vsel %vm32_vm0, %v26_v7, -inf }
   0xc   :  { %v48_v12 = vrot.slane %v47_v11, 4  ;;  %v54_v13 = vsel %vm32_vm0, %v27_v10, -inf  ;;  %v195_v10 = vld [vmem:[#allocation3] sm:$0xf] }
   0xd   :  { %v35_v14 = vmax.f32 %v33_v5, %v34_v8  ;;  %v42_v15 = vmax.f32 %v40_v6, %v41_v9  ;;  %v55_v16 = vrot.slane %v54_v13, 4 }
   0xe   :  { %v49_v18 = vmax.f32 %v47_v11, %v48_v12 }
   0xf   :  { %v36_v20 = vrot.slane %v35_v14, 2  ;;  %v43_v21 = vrot.slane %v42_v15, 2  ;;  %v56_v24 = vmax.f32 %v54_v13, %v55_v16 }
  0x10   :  { %v50_v25 = vrot.slane %v49_v18, 2 }
  0x11   :  { %v37_v26 = vmax.f32 %v35_v14, %v36_v20  ;;  %v44_v27 = vmax.f32 %v42_v15, %v43_v21  ;;  %v57_v28 = vrot.slane %v56_v24, 2 }
  0x12   :  { %v51_v30 = vmax.f32 %v49_v18, %v50_v25 }
  0x13   :  { %v38_v31 = vrot.slane %v37_v26, 1  ;;  %v45_v32 = vrot.slane %v44_v27, 1  ;;  %v58_v34 = vmax.f32 %v56_v24, %v57_v28 }
  0x14   :  { %v52_v36 = vrot.slane %v51_v30, 1 }
  0x15   :  { %v252_v35 = vmax.f32 %v44_v27, %v45_v32  ;;  %v59_v37 = vrot.slane %v58_v34, 1  ;;  %v254_v38 = vmax.f32 %v37_v26, %v38_v31 }
  0x16   :  { %v261_v43 = vmax.f32 %v51_v30, %v52_v36 }
  0x17   :  { %v65_v39 = vrot.slane %v252_v35, 4  ;;  %v257_v41 = vmax.f32 %v58_v34, %v59_v37  ;;  %vm132_vm9 = vcmp.gt.f32.partialorder %v252_v35, -inf  ;;  %vm343_vm12 = vcmp.gt.f32.partialorder %v254_v38, -inf }
  0x18   :  { %v136_v9 = vsel %vm132_vm9, %v252_v35, -inf  ;;  %vm133_vm14 = vcmp.gt.f32.partialorder %v261_v43, -inf  ;;  %v135_v24 = vsel %vm343_vm12, %v254_v38, -inf }
  0x19   :  { %v67_v42 = vsel %vm32_vm0, %v254_v38, %v65_v39  ;;  %v66_v44 = vrot.slane %v257_v41, 4  ;;  %vm134_vm11 = vcmp.gt.f32.partialorder %v257_v41, -inf  ;;  %v137_v26 = vsel %vm133_vm14, %v261_v43, -inf }
  0x1a   :  { %vm71_vm1 = vcmp.eq.f32.partialorder %v15_v0, %v67_v42  ;;  %v138_v13 = vsel %vm134_vm11, %v257_v41, -inf }
  0x1b   :  { %v77_v45 = vsel %vm71_vm1, %v76_v40, 2147483647  ;;  %v68_v46 = vsel %vm32_vm0, %v261_v43, %v66_v44  ;;  %vm177_vm1 = vcmask 1041408  }
  0x1c   :  { %79 = vst [vmem:[#allocation1] ss:$2 sm:$0xff] %v77_v45  ;;  %vm72_vm2 = vcmp.eq.f32.partialorder %v16_v1, %v68_v46 }
  0x1d   :  { %v78_v47 = vsel %vm72_vm2, %v76_v40, 2147483647 }
  0x1e   :  { %83 = vst [vmem:[#allocation1 + $0x10] ss:$2 sm:$0xff] %v78_v47 }
  0x23   :  { %v80_v49 = vld.sshfl [vmem:[#allocation1] sm:$0xff pattern:$0x75316420]  ;;  %v81_v50 = vld.sshfl [vmem:[#allocation1 + $0x8] sm:$0xff pattern:$0x75316420] }
  0x24   :  { %v86_v51 = vsel %vm32_vm0, %v80_v49, 2147483647  ;;  %v96_v52 = vsel %vm32_vm0, %v81_v50, 2147483647 }
  0x25   :  { %v84_v53 = vld.sshfl [vmem:[#allocation1 + $0x10] sm:$0xff pattern:$0x75316420]  ;;  %v85_v54 = vld.sshfl [vmem:[#allocation1 + $0x18] sm:$0xff pattern:$0x75316420] }
  0x26   :  { %145 = vst [vmem:[#allocation1] ss:$4 sm:$0xff] %v143_v48  ;;  %v87_v55 = vrot.slane %v86_v51, 4  ;;  %v97_v56 = vrot.slane %v96_v52, 4  ;;  %v106_v57 = vsel %vm32_vm0, %v84_v53, 2147483647 }
  0x27   :  { %v107_v58 = vrot.slane %v106_v57, 4  ;;  %v116_v59 = vsel %vm32_vm0, %v85_v54, 2147483647 }
  0x28   :  { %vm88_vm3 = vcmp.lt.s32.totalorder %v86_v51, %v87_v55  ;;  %vm98_vm4 = vcmp.lt.s32.totalorder %v96_v52, %v97_v56  ;;  %v117_v60 = vrot.slane %v116_v59, 4 }
  0x29   :  { %v99_v61 = vsel %vm98_vm4, %v96_v52, %v97_v56  ;;  %vm108_vm5 = vcmp.lt.s32.totalorder %v106_v57, %v107_v58  ;;  %v89_v0 = vsel %vm88_vm3, %v86_v51, %v87_v55 }
  0x2a   :  { %v100_v62 = vrot.slane %v99_v61, 2  ;;  %v109_v63 = vsel %vm108_vm5, %v106_v57, %v107_v58  ;;  %vm118_vm6 = vcmp.lt.s32.totalorder %v116_v59, %v117_v60  ;;  %v90_v6 = vrot.slane %v89_v0, 2 }
  0x2b   :  { %v119_v1 = vsel %vm118_vm6, %v116_v59, %v117_v60  ;;  %v110_v2 = vrot.slane %v109_v63, 2  ;;  %vm185_vm5 = vcmask 1041409   ;;  %vm187_vm6 = vcmask 1043459  }
  0x2c   :  { %v120_v3 = vrot.slane %v119_v1, 2  ;;  %vm101_vm7 = vcmp.lt.s32.totalorder %v99_v61, %v100_v62  ;;  %vm91_vm13 = vcmp.lt.s32.totalorder %v89_v0, %v90_v6 }
  0x2d   :  { %v270_v4 = vld.sshfl [vmem:[#allocation1] sm:$0xff pattern:$0x73625140]  ;;  %v272_v5 = vld.sshfl [vmem:[#allocation1 + $0x8] sm:$0xff pattern:$0x73625140]  ;;  %vm111_vm10 = vcmp.lt.s32.totalorder %v109_v63, %v110_v2  ;;  %v102_v7 = vsel %vm101_vm7, %v99_v61, %v100_v62  ;;  %v92_v19 = vsel %vm91_vm13, %v89_v0, %v90_v6 }
  0x2e   :  { %158 = vst [vmem:[#allocation1] ss:$4 sm:$0xff] %v143_v48  ;;  %vm121_vm8 = vcmp.lt.s32.totalorder %v119_v1, %v120_v3  ;;  %v149_v11 = vrot.slane %v272_v5, 1  ;;  %v112_v12 = vsel %vm111_vm10, %v109_v63, %v110_v2  ;;  %v148_v14 = vrot.slane %v270_v4, 1 }
  0x2f   :  { %v122_v8 = vsel %vm121_vm8, %v119_v1, %v120_v3  ;;  %v103_v15 = vrot.slane %v102_v7, 1  ;;  %vm155_vm15 = vcmp.gt.f32.partialorder %v136_v9, %v272_v5  ;;  %v113_v23 = vrot.slane %v112_v12, 1 }
  0x30   :  { %v123_v16 = vrot.slane %v122_v8, 1  ;;  %vm292_vm0 = vcmp.gt.f32.partialorder %v138_v13, %v149_v11  ;;  %v93_v28 = vrot.slane %v92_v19, 1  ;;  %vm301_vm3 = vcmp.gt.f32.partialorder %v137_v26, %v148_v14 }
  0x31   :  { %vm104_vm2 = vcmp.lt.s32.totalorder %v102_v7, %v103_v15  ;;  %vm114_vm7 = vcmp.lt.s32.totalorder %v112_v12, %v113_v23  ;;  %vm154_vm8 = vcmp.gt.f32.partialorder %v135_v24, %v270_v4  ;;  %vm189_vm10 = vcmask 1045509  }
  0x32   :  { %vm124_vm4 = vcmp.lt.s32.totalorder %v122_v8, %v123_v16  ;;  %v105_v34 = vsel %vm104_vm2, %v102_v7, %v103_v15  ;;  %vm191_vm13 = vcmask 1047559   ;;  %vm94_vm12 = vcmp.lt.s32.totalorder %v92_v19, %v93_v28 }
  0x33   :  { %v125_v39 = vsel %vm124_vm4, %v122_v8, %v123_v16  ;;  %v115_v42 = vsel %vm114_vm7, %v112_v12, %v113_v23  ;;  %v140_v47 = vsel %vm132_vm9, %v105_v34, 0  ;;  %v95_v54 = vsel %vm94_vm12, %v92_v19, %v93_v28 }
  0x34   :  { %v142_v51 = vsel %vm134_vm11, %v125_v39, 0  ;;  %v141_v35 = vsel %vm133_vm14, %v115_v42, 0  ;;  %vm348_vm9 = vcmp.gt.f32.partialorder %v254_v38, -inf }
  0x35   :  { %v159_v17 = vld.sshfl [vmem:[#allocation1] sm:$0xff pattern:$0x73625140]  ;;  %v160_v18 = vld.sshfl [vmem:[#allocation1 + $0x8] sm:$0xff pattern:$0x73625140] }
  0x36   :  { %196 = vst [vmem:[#allocation1] ss:$4 sm:$0xff] %v195_v10  ;;  %v161_v20 = vrot.slane %v159_v17, 1  ;;  %v162_v21 = vrot.slane %v160_v18, 1  ;;  %v168_v22 = vsel %vm155_vm15, %v136_v9, %v160_v18  ;;  %v167_v36 = vsel %vm154_vm8, %v135_v24, %v159_v17 }
  0x37   :  { %v175_v30 = vrot.slane %v168_v22, 6  ;;  %v139_v59 = vsel %vm348_vm9, %v95_v54, 0 }
  0x38   :  { %v170_v27 = vsel %vm292_vm0, %v138_v13, %v162_v21  ;;  %v169_v32 = vsel %vm301_vm3, %v137_v26, %v161_v20 }
  0x39   :  { %v176_v31 = vrot.slane %v170_v27, 6  ;;  %v178_v40 = vsel %vm177_vm1, %v167_v36, %v175_v30 }
  0x3b   :  { %v179_v33 = vsel %vm177_vm1, %v169_v32, %v176_v31 }
  0x3c   :  { %v184_v37 = vrot.slane %v179_v33, 7 }
  0x3d   :  { %v197_v44 = vld.sshfl [vmem:[#allocation1] sm:$0xff pattern:$0x73625140]  ;;  %v198_v45 = vld.sshfl [vmem:[#allocation1 + $0x8] sm:$0xff pattern:$0x73625140] }
  0x3e   :  { %v186_v46 = vsel %vm185_vm5, %v184_v37, %v178_v40  ;;  %v199_v48 = vrot.slane %v197_v44, 1  ;;  %v200_v49 = vrot.slane %v198_v45, 1  ;;  %v202_v52 = vsel %vm155_vm15, %v140_v47, %v198_v45 }
  0x3f   :  { %v188_v50 = vsel %vm187_vm6, %v184_v37, %v186_v46  ;;  %v205_v57 = vrot.slane %v202_v52, 6  ;;  %v201_v61 = vsel %vm154_vm8, %v139_v59, %v197_v44 }
  0x40   :  { %v190_v53 = vsel %vm189_vm10, %v184_v37, %v188_v50  ;;  %v204_v55 = vsel %vm292_vm0, %v142_v51, %v200_v49  ;;  %v203_v41 = vsel %vm301_vm3, %v141_v35, %v199_v48 }
  0x41   :  { %v192_v56 = vsel %vm191_vm13, %v184_v37, %v190_v53  ;;  %v206_v58 = vrot.slane %v204_v55, 6  ;;  %v207_v63 = vsel %vm177_vm1, %v201_v61, %v205_v57 }
  0x42   :  { %194 = vst [vmem:[#allocation2] sm:$0xf] %v192_v56 }
  0x43   :  { %v208_v60 = vsel %vm177_vm1, %v203_v41, %v206_v58 }
  0x44   :  { %v211_v62 = vrot.slane %v208_v60, 7 }
  0x46   :  { %v212_v43 = vsel %vm185_vm5, %v211_v62, %v207_v63 }
  0x47   :  { %v213_v0 = vsel %vm187_vm6, %v211_v62, %v212_v43 }
  0x48   :  { %v214_v1 = vsel %vm189_vm10, %v211_v62, %v213_v0 }
  0x49   :  { %v215_v2 = vsel %vm191_vm13, %v211_v62, %v214_v1 }
  0x4a   :  { %216 = vst [vmem:[#allocation3] sm:$0xf] %v215_v2 }
  0x51   :  { %v220_v3 = vld [vmem:[#allocation3] sm:$0xf] }
  0x52   :  { %221 = vst [vmem:[%s342_s1] sm:$0xf] %v220_v3 }

</bundles_post_ra>
